<compile_context>
chip_gen: v7x
topology: tpu7x:2x2x1
jax: 0.10.0
libtpu: 0.0.40
codegen_flags: <defaults>
</compile_context>

<pallas_src>
import numpy as np
import jax
import jax.numpy as jnp
from jax.experimental import pallas as pl
from jax.experimental.pallas import tpu as pltpu

INPUT_DIM = 11
HIDDEN = 64
N_NODES = 8                 # nodes per graph
N_EDGES = 16                # edges per graph
F_PAD = 16                  # INPUT_DIM padded for the W1 block
LANES = 128                 # lane-dense vreg row width

GRAPHS_PER_STEP = 16                          # graphs packed per grid step
ROWS_N = GRAPHS_PER_STEP * N_NODES            # 128 node rows / step
ROWS_OP = GRAPHS_PER_STEP * (N_NODES + 1)     # 144 = block-diag A rows + mean rows

# ---- weight-slab row layout: one (W_ROWS, 128) f32 slab ---------------------
W_ROWS = F_PAD + HIDDEN + 8   # 88
W1_ROW0 = 0                   # rows 0:16,  lanes 0:64  -> W1
WH_ROW0 = F_PAD               # rows 16:80              -> [W2 | Wv | Wn | 0..]
B1_ROW = F_PAD + HIDDEN       # row 80,     lanes 0:64  -> b1
BH_ROW = B1_ROW + 1           # row 81,     lanes 0:3   -> [b2, bv, bn]


# ------------------------------ Pallas kernel --------------------------------
def _simplenet_kernel(a_op_ref, x_ref, w_ref, o_ref):
    # bf16 MXU operands, f32 accumulation.
    a_op = a_op_ref[...].astype(jnp.bfloat16)                 # (144, 128)
    a_blk = a_op[0:ROWS_N, :]                                 # (128, 128) block-diag A_norm
    x = x_ref[...].astype(jnp.bfloat16)                       # (128, 16)

    w1 = w_ref[W1_ROW0:W1_ROW0 + F_PAD, 0:HIDDEN].astype(jnp.bfloat16)   # (16, 64)
    wh = w_ref[WH_ROW0:WH_ROW0 + HIDDEN, :].astype(jnp.bfloat16)         # (64, 128)
    b1 = w_ref[B1_ROW:B1_ROW + 1, 0:HIDDEN]                   # (1, 64)  f32
    bh = w_ref[BH_ROW:BH_ROW + 1, :]                          # (1, 128) f32

    # conv_succ1: relu(A_norm @ (X @ W1) + b1) for all 16 graphs at once.
    xw = jnp.dot(x, w1, preferred_element_type=jnp.float32)              # (128, 64)
    h = jnp.maximum(
        jnp.dot(a_blk, xw.astype(jnp.bfloat16),
                preferred_element_type=jnp.float32) + b1, 0.0)           # (128, 64)

    # fused heads: lane0 = H@W2, lane1 = H@Wv, lane2 = H@Wn
    hw = jnp.dot(h.astype(jnp.bfloat16), wh,
                 preferred_element_type=jnp.float32)                     # (128, 128)

    # One matmul yields conv_probs (rows 0:128) AND the per-graph node means
    # (rows 128:144 -- 1/N rows folded into the operand), so no XLU reduction.
    ops = jnp.dot(a_op, hw.astype(jnp.bfloat16),
                  preferred_element_type=jnp.float32)                    # (144, 128)

    # Lane-dense unmasked store:
    #   rows 0:128   lane 0 -> per-node conv_probs logits (+ b2)
    #   rows 128:144 lane 1 -> value (+ bv), lane 2 -> do_nothing logit (+ bn)
    o_ref[...] = ops + bh


# ------------------------------- jitted forward ------------------------------
@jax.jit
def simplenet_batched(a_op_all, x_all, ready, w_slab):
    num_steps = a_op_all.shape[0] // ROWS_OP
    flops = 2 * num_steps * (ROWS_N * F_PAD * HIDDEN
                             + ROWS_N * ROWS_N * HIDDEN
                             + ROWS_N * HIDDEN * LANES
                             + ROWS_OP * ROWS_N * LANES)
    bytes_accessed = 4 * (num_steps * (2 * ROWS_OP * LANES + ROWS_N * F_PAD)
                          + W_ROWS * LANES)

    out = pl.pallas_call(
        _simplenet_kernel,
        out_shape=jax.ShapeDtypeStruct((num_steps * ROWS_OP, LANES), jnp.float32),
        grid=(num_steps,),
        in_specs=[
            pl.BlockSpec((ROWS_OP, LANES), lambda s: (s, 0)),   # per-step operator slab
            pl.BlockSpec((ROWS_N, F_PAD), lambda s: (s, 0)),    # per-step node features
            pl.BlockSpec((W_ROWS, LANES), lambda s: (0, 0)),    # weights: DMA once, resident
        ],
        out_specs=pl.BlockSpec((ROWS_OP, LANES), lambda s: (s, 0)),
        compiler_params=pltpu.CompilerParams(dimension_semantics=("parallel",)),
        cost_estimate=pl.CostEstimate(flops=flops, transcendentals=0,
                                      bytes_accessed=bytes_accessed),
    )(a_op_all, x_all, w_slab)

    out = out.reshape(num_steps, ROWS_OP, LANES)
    node_logits = out[:, :ROWS_N, 0].reshape(-1, N_NODES)       # (G, 8)
    v = out[:, ROWS_N:, 1].reshape(-1)                          # (G,)
    pn = out[:, ROWS_N:, 2].reshape(-1)                         # (G,)

    # Batched masked softmax over [probs[ready nodes], prob_nothing] (length N+1).
    # Safe even for an all-False ready row: the prob_nothing column is unmasked.
    rmask = ready.astype(jnp.float32)                           # (G, 8)
    logits = jnp.concatenate([node_logits, pn[:, None]], axis=1)        # (G, 9)
    mask = jnp.concatenate([rmask, jnp.ones_like(pn[:, None])], axis=1) # (G, 9)
    neg = jnp.float32(-1e30)
    ml = jnp.where(mask > 0.5, logits, neg)
    mx = jnp.max(ml, axis=1, keepdims=True)
    e = jnp.exp(ml - mx) * mask                                 # exact 0 at !ready
    probs = e / jnp.sum(e, axis=1, keepdims=True)               # (G, 9)
    return probs, v


# ------------------------------- packing helpers -----------------------------
def pack_params(params):
    """Pack all weights/biases into one (W_ROWS, 128) f32 slab (once per model)."""
    wh = jnp.concatenate([params["w2"], params["wv"], params["wn"]], axis=1)  # (64, 3)
    bh = jnp.stack([params["b2"], params["bv"], params["bn"]])                # (3,)
    slab = jnp.zeros((W_ROWS, LANES), jnp.float32)
    slab = slab.at[0:INPUT_DIM, 0:HIDDEN].set(params["w1"])
    slab = slab.at[WH_ROW0:WH_ROW0 + HIDDEN, 0:3].set(wh)
    slab = slab.at[B1_ROW, 0:HIDDEN].set(params["b1"])
    slab = slab.at[BH_ROW, 0:3].set(bh)
    return slab


def pack_graph_batch(a_norms, xs):
    """Lay G graphs out as grid-step blocks (plain numpy, once per batch):
       per step a (144,128) operator slab (block-diag A_norm + 1/N mean rows)
       and a (128,16) feature block."""
    G = len(xs)
    assert G % GRAPHS_PER_STEP == 0
    num_steps = G // GRAPHS_PER_STEP
    a_op = np.zeros((num_steps * ROWS_OP, LANES), np.float32)
    x_all = np.zeros((num_steps * ROWS_N, F_PAD), np.float32)
    for g in range(G):
        s, r = divmod(g, GRAPHS_PER_STEP)
        r0 = r * N_NODES
        a_op[s * ROWS_OP + r0: s * ROWS_OP + r0 + N_NODES, r0:r0 + N_NODES] = a_norms[g]
        a_op[s * ROWS_OP + ROWS_N + r, r0:r0 + N_NODES] = 1.0 / N_NODES
        x_all[s * ROWS_N + r0: s * ROWS_N + r0 + N_NODES, 0:INPUT_DIM] = xs[g]
    return jnp.asarray(a_op), jnp.asarray(x_all)


# ---------------------- graph / parameter construction -----------------------
def gcn_norm_dense(edge_index, num_nodes):
    """Dense normalized adjacency reproducing GCNConv(flow='target_to_source')."""
    row = np.concatenate([edge_index[0], np.arange(num_nodes)])   # add self-loops
    col = np.concatenate([edge_index[1], np.arange(num_nodes)])
    a_hat = np.zeros((num_nodes, num_nodes), dtype=np.float32)
    np.add.at(a_hat, (row, col), 1.0)
    deg = a_hat.sum(axis=1)
    dinv = np.where(deg > 0, deg ** -0.5, 0.0).astype(np.float32)
    return (dinv[:, None] * a_hat * dinv[None, :]).astype(np.float32)


def make_params(key):
    ks = jax.random.split(key, 8)
    s = 0.1
    return {
        "w1": s * jax.random.normal(ks[0], (INPUT_DIM, HIDDEN), jnp.float32),
        "b1": s * jax.random.normal(ks[1], (HIDDEN,), jnp.float32),
        "w2": s * jax.random.normal(ks[2], (HIDDEN, 1), jnp.float32),
        "b2": s * jax.random.normal(ks[3], (), jnp.float32),
        "wv": s * jax.random.normal(ks[4], (HIDDEN, 1), jnp.float32),
        "bv": s * jax.random.normal(ks[5], (), jnp.float32),
        "wn": s * jax.random.normal(ks[6], (HIDDEN, 1), jnp.float32),
        "bn": s * jax.random.normal(ks[7], (), jnp.float32),
    }


def reference_forward_np(a_norm, x, params, ready_bool):
    """float64 numpy reference of the PyTorch forward (one graph)."""
    a = np.asarray(a_norm, np.float64)
    xf = np.asarray(x, np.float64)
    p = {k: np.asarray(val, np.float64) for k, val in params.items()}
    h = np.maximum(a @ (xf @ p["w1"]) + p["b1"], 0.0)
    probs = a @ (h @ p["w2"]) + p["b2"]
    x_mean = h.mean(axis=0)
    v = x_mean @ p["wv"] + p["bv"]
    pn = x_mean @ p["wn"] + p["bn"]
    logits = np.concatenate([probs[np.asarray(ready_bool, bool), 0], pn])
    e = np.exp(logits - logits.max())
    return e / e.sum(), v


# ----------------------------------- demo ------------------------------------
if __name__ == "__main__":
    G = 64                                            # 4 grid steps of 16 graphs
    root = jax.random.PRNGKey(0)
    k_x, k_src, k_off, k_ready, k_par = jax.random.split(root, 5)

    xs = np.asarray(jax.random.normal(k_x, (G, N_NODES, INPUT_DIM), jnp.float32))
    src = np.asarray(jax.random.randint(k_src, (G, N_EDGES), 0, N_NODES))
    off = np.asarray(jax.random.randint(k_off, (G, N_EDGES), 1, N_NODES))
    dst = (src + off) % N_NODES                       # no self-loops
    ready = np.asarray(jax.random.bernoulli(k_ready, 0.6, (G, N_NODES)))

    a_norms = [gcn_norm_dense(np.stack([src[g], dst[g]]).astype(np.int32), N_NODES)
               for g in range(G)]

    params = make_params(k_par)
    w_slab = pack_params(params)
    a_op_all, x_all = pack_graph_batch(a_norms, xs)
    ready_j = jnp.asarray(ready)

    probs, v = simplenet_batched(a_op_all, x_all, ready_j, w_slab)
    jax.block_until_ready((probs, v))

    probs_np = np.asarray(probs)
    v_np = np.asarray(v)
    assert probs_np.shape == (G, N_NODES + 1) and v_np.shape == (G,)
    assert np.isfinite(probs_np).all() and np.isfinite(v_np).all()
    assert np.allclose(probs_np.sum(axis=1), 1.0, atol=1e-5)

    for g in range(G):
        ref_probs, ref_v = reference_forward_np(a_norms[g], xs[g], params, ready[g])
        rb = ready[g].astype(bool)
        # non-ready node entries are exactly zero in the fixed-size output
        assert np.all(probs_np[g][:N_NODES][~rb] == 0.0)
        sel = np.concatenate([rb, np.ones((1,), bool)])
        got = probs_np[g][sel]                        # PyTorch-shaped dynamic output
        assert got.shape == ref_probs.shape
        # loose tolerance: bf16 MXU operands (same precision class as f32 DEFAULT)
        assert np.allclose(got, ref_probs, atol=2e-2, rtol=2e-2)
        assert np.allclose(v_np[g], ref_v, atol=2e-2, rtol=2e-2)

    print("KERNEL_OK")
</pallas_src>

<mosaic_0001>
module attributes {stable_mosaic.version = 11 : i64} {
  func.func @_simplenet_kernel(%arg0: i32, %arg1: memref<144x128xf32, #tpu.memory_space<vmem>>, %arg2: memref<128x16xf32, #tpu.memory_space<vmem>>, %arg3: memref<88x128xf32, #tpu.memory_space<vmem>>, %arg4: memref<144x128xf32, #tpu.memory_space<vmem>>) attributes {dimension_semantics = [#tpu.dimension_semantics<parallel>], iteration_bounds = array<i64: 4>, scalar_prefetch = 0 : i64, scratch_operands = 0 : i64, tpu.core_type = #tpu.core_type<tc>, window_params = [{transform_indices = @transform_0, window_bounds = array<i64: 144, 128>}, {transform_indices = @transform_1, window_bounds = array<i64: 128, 16>}, {pipeline_mode = #tpu.pipeline_mode<synchronous>, transform_indices = @transform_2, window_bounds = array<i64: 88, 128>}, {transform_indices = @transform_3, window_bounds = array<i64: 144, 128>}]} {
    %c0 = arith.constant 0 : index
    %c0_0 = arith.constant 0 : index
    %0 = vector.load %arg1[%c0, %c0_0] : memref<144x128xf32, #tpu.memory_space<vmem>>, vector<144x128xf32>
    %1 = arith.truncf %0 : vector<144x128xf32> to vector<144x128xbf16>
    %2 = vector.extract_strided_slice %1 {offsets = [0, 0], sizes = [128, 128], strides = [1, 1]} : vector<144x128xbf16> to vector<128x128xbf16>
    %c0_1 = arith.constant 0 : index
    %c0_2 = arith.constant 0 : index
    %3 = vector.load %arg2[%c0_1, %c0_2] : memref<128x16xf32, #tpu.memory_space<vmem>>, vector<128x16xf32>
    %4 = arith.truncf %3 : vector<128x16xf32> to vector<128x16xbf16>
    %c0_3 = arith.constant 0 : index
    %c0_4 = arith.constant 0 : index
    %5 = vector.load %arg3[%c0_3, %c0_4] : memref<88x128xf32, #tpu.memory_space<vmem>>, vector<16x64xf32>
    %6 = arith.truncf %5 : vector<16x64xf32> to vector<16x64xbf16>
    %c16 = arith.constant 16 : index
    %c0_5 = arith.constant 0 : index
    %7 = vector.load %arg3[%c16, %c0_5] : memref<88x128xf32, #tpu.memory_space<vmem>>, vector<64x128xf32>
    %8 = arith.truncf %7 : vector<64x128xf32> to vector<64x128xbf16>
    %c80 = arith.constant 80 : index
    %c0_6 = arith.constant 0 : index
    %9 = vector.load %arg3[%c80, %c0_6] : memref<88x128xf32, #tpu.memory_space<vmem>>, vector<1x64xf32>
    %c81 = arith.constant 81 : index
    %c0_7 = arith.constant 0 : index
    %10 = vector.load %arg3[%c81, %c0_7] : memref<88x128xf32, #tpu.memory_space<vmem>>, vector<1x128xf32>
    %cst = arith.constant dense<0.000000e+00> : vector<128x64xf32>
    %11 = tpu.matmul %4, %6, %cst {dimension_numbers = #tpu.dot_dimension_numbers<[1], [0], [0], [1], [0, 0, 1, 1], [], []>} : vector<128x16xbf16>, vector<16x64xbf16>, vector<128x64xf32> -> vector<128x64xf32>
    %12 = arith.truncf %11 : vector<128x64xf32> to vector<128x64xbf16>
    %cst_8 = arith.constant dense<0.000000e+00> : vector<128x64xf32>
    %13 = tpu.matmul %2, %12, %cst_8 {dimension_numbers = #tpu.dot_dimension_numbers<[1], [0], [0], [1], [0, 0, 1, 1], [], []>} : vector<128x128xbf16>, vector<128x64xbf16>, vector<128x64xf32> -> vector<128x64xf32>
    %14 = vector.broadcast %9 : vector<1x64xf32> to vector<128x64xf32>
    %15 = arith.addf %13, %14 : vector<128x64xf32>
    %cst_9 = arith.constant 0.000000e+00 : f32
    %16 = vector.broadcast %cst_9 : f32 to vector<128x64xf32>
    %17 = arith.maximumf %15, %16 : vector<128x64xf32>
    %18 = arith.truncf %17 : vector<128x64xf32> to vector<128x64xbf16>
    %cst_10 = arith.constant dense<0.000000e+00> : vector<128x128xf32>
    %19 = tpu.matmul %18, %8, %cst_10 {dimension_numbers = #tpu.dot_dimension_numbers<[1], [0], [0], [1], [0, 0, 1, 1], [], []>} : vector<128x64xbf16>, vector<64x128xbf16>, vector<128x128xf32> -> vector<128x128xf32>
    %20 = arith.truncf %19 : vector<128x128xf32> to vector<128x128xbf16>
    %cst_11 = arith.constant dense<0.000000e+00> : vector<144x128xf32>
    %21 = tpu.matmul %1, %20, %cst_11 {dimension_numbers = #tpu.dot_dimension_numbers<[1], [0], [0], [1], [0, 0, 1, 1], [], []>} : vector<144x128xbf16>, vector<128x128xbf16>, vector<144x128xf32> -> vector<144x128xf32>
    %22 = vector.broadcast %10 : vector<1x128xf32> to vector<144x128xf32>
    %23 = arith.addf %21, %22 : vector<144x128xf32>
    %c0_12 = arith.constant 0 : index
    %c0_13 = arith.constant 0 : index
    %24 = vector.load %arg4[%c0_12, %c0_13] : memref<144x128xf32, #tpu.memory_space<vmem>>, vector<144x128xf32>
    tpu.vector_store %arg4[%c0_12, %c0_13], %23 {strides = array<i32>} : memref<144x128xf32, #tpu.memory_space<vmem>>, vector<144x128xf32>,
    return
  }
  func.func @transform_0(%arg0: i32) -> (i32, i32) {
    %c0_i32 = arith.constant 0 : i32
    %c0_i32_0 = arith.constant 0 : i32
    return %arg0, %c0_i32 : i32, i32
  }
  func.func @transform_1(%arg0: i32) -> (i32, i32) {
    %c0_i32 = arith.constant 0 : i32
    %c0_i32_0 = arith.constant 0 : i32
    return %arg0, %c0_i32 : i32, i32
  }
  func.func @transform_2(%arg0: i32) -> (i32, i32) {
    %c0_i32 = arith.constant 0 : i32
    %c0_i32_0 = arith.constant 0 : i32
    %c0_i32_1 = arith.constant 0 : i32
    return %c0_i32, %c0_i32_0 : i32, i32
  }
  func.func @transform_3(%arg0: i32) -> (i32, i32) {
    %c0_i32 = arith.constant 0 : i32
    %c0_i32_0 = arith.constant 0 : i32
    return %arg0, %c0_i32 : i32, i32
  }
}

</mosaic_0001>

<bundles_post_ra>
// kernel: squeeze.4
= control target key start
LH: loop header
LB: loop body
LE: loop exit
PB: predicated region body
PF: predicated region fallthrough
CT: control target
= control target key end

     0   :  { %s101_s0 = inlined_call_operand.vmem [shape: f32[4,16], index: 0, kind: input, shape index: {}]   ;;  %s102_s1 = inlined_call_operand.hbm [shape: f32[64], index: 1, kind: output, shape index: {}]  }
   0x1   :  { %v5_v0 = vld [vmem:[%s101_s0] sm:$0xf] }
   0x2   :  { %6 = vst [vmem:[#allocation3] sm:$0xf] %v5_v0 }
   0x3   :  { %2 = vsyncpa [#allocation1], 0  ;;  %vm8_vm0 = vcmask 130048   ;;  %s72_s0 = smov 48   ;;  %s73_s8 = smov 16   ;;  %vm14_vm1 = vcmask 523648  }
   0x4   :  { %s74_s9 = smov 32   ;;  %vm20_vm2 = vcmask 392448   ;;  %vm26_vm3 = vcmask 261248   ;;  %s75_s10 = smov [#allocation0]  }
   0x5   :  { %s38_s11 = sshll.u32 %s75_s10, 4  ;;  %s39_s11 = int_to_ptr.vmem [resolvable:$true] %s38_s11 }
   0x6   :  { %s48_s12 = scalar_lea.vmem %s39_s11, 16  ;;  %s52_s13 = scalar_lea.vmem %s39_s11, 32 }
   0x7   :  { %p49_p0 = scmp.ne.s32.totalorder %s39_s11, %s48_s12  ;;  %p53_p1 = scmp.lt.s32.totalorder %s39_s11, %s39_s11 }
   0x8   :  { %p54_p2 = scmp.lt.s32.totalorder %s52_s13, %s48_s12 }
   0x9   :  { %v11_v1 = vld [vmem:[#allocation3 + $0x3] sm:$0x1]   ;;  %v23_v2 = vld [vmem:[#allocation3 + $0x1] sm:$0x1]   ;;  %v7_v3 = vld [vmem:[#allocation3] sm:$0x1]  }
   0xa   :  { %12 = vrot.lane.b32.xlu0 %v11_v1, %s72_s0  ;;  %24 = vrot.lane.b32.xlu1 %v23_v2, %s73_s8  ;;  %v17_v4 = vld [vmem:[#allocation3 + $0x2] sm:$0x1]   ;;  %9 = vst.msk [vmem:[#allocation2] sm:$0x1] %vm8_vm0, %v7_v3   ;;  %p55_p3 = por %p54_p2, %p53_p1 }
   0xc   :  { %p56_p4 = pnand %p55_p3, %p49_p0 }
   0xe   :  { %18 = vrot.lane.b32.xlu0 %v17_v4, %s74_s9 }
  0x7c   :  { %v13_v5 = vpop.permute.xlu0 %12   ;;  %v25_v6 = vpop.permute.xlu1 %24  }
  0x7d   :  { %15 = vst.msk [vmem:[#allocation2] sm:$0x1] %vm14_vm1, %v13_v5  }
  0x80   :  { %v19_v7 = vpop.permute.xlu0 %18  }
  0x81   :  { %21 = vst.msk [vmem:[#allocation2] sm:$0x1] %vm20_vm2, %v19_v7  }
  0x82   :  { %27 = vst.msk [vmem:[#allocation2] sm:$0x1] %vm26_vm3, %v25_v6  }
  0x89   :  { %v31_v8 = vld [vmem:[#allocation2] sm:$0x1] }
  0x8a   :  { %33 = vst [vmem:[#allocation0] sm:$0x1] %v31_v8 }
  0x8b   :  { %59 = shalt.err (!%p56_p4)
}
  0x8c   :  { %s60_s16 = scalar_lea.hbm %s102_s1, 16 }
  0x8d   :  { %p61_p5 = scmp.ne.s32.totalorder %s102_s1, %s60_s16  ;;  %p64_p6 = scmp.lt.u32.totalorder %s60_s16, %s102_s1 }
  0x8f   :  { %p66_p7 = pnand %p64_p6, %p61_p5 }
  0x91   :  { %69 = shalt.err (!%p66_p7)
}
  0x92   :  { %41 = dma.vmem_to_hbm [thread:$0]  %s39_s11, 16, %s102_s1, [#allocation1]  }
  0x93   :  { %70 = dma.done.wait [#allocation1], 16  }
  0x94   :  { %71 = vsyncadd [#allocation1], 4294967280 }
  0x95   :  { %43 = vsyncpa [#allocation1], 1 }

// kernel: squeeze.5
= control target key start
LH: loop header
LB: loop body
LE: loop exit
PB: predicated region body
PF: predicated region fallthrough
CT: control target
= control target key end

     0   :  { %vm7_vm0 = vcmask 130048   ;;  %s37_s8 = smov 16   ;;  %s38_s9 = smov 32   ;;  %vm13_vm1 = vcmask 523648   ;;  %vm19_vm2 = vcmask 392448   ;;  %vm25_vm3 = vcmask 261248   ;;  %s55_s0 = inlined_call_operand.vmem [shape: f32[4,16], index: 0, kind: input, shape index: {}]   ;;  %s56_s1 = inlined_call_operand.vmem [shape: f32[64,1], index: 1, kind: output, shape index: {}]  }
   0x1   :  { %v4_v0 = vld [vmem:[%s55_s0] sm:$0xf]  ;;  %s36_s0 = smov 48  }
   0x2   :  { %5 = vst [vmem:[#allocation1] sm:$0xf] %v4_v0 }
   0x9   :  { %v10_v1 = vld [vmem:[#allocation1 + $0x3] sm:$0x1]   ;;  %v22_v2 = vld [vmem:[#allocation1 + $0x1] sm:$0x1]   ;;  %v6_v3 = vld [vmem:[#allocation1] sm:$0x1]  }
   0xa   :  { %11 = vrot.lane.b32.xlu0 %v10_v1, %s36_s0  ;;  %23 = vrot.lane.b32.xlu1 %v22_v2, %s37_s8  ;;  %v16_v4 = vld [vmem:[#allocation1 + $0x2] sm:$0x1]   ;;  %8 = vst.msk [vmem:[#allocation0] sm:$0x1] %vm7_vm0, %v6_v3  }
   0xe   :  { %17 = vrot.lane.b32.xlu0 %v16_v4, %s38_s9 }
  0x7c   :  { %v12_v5 = vpop.permute.xlu0 %11   ;;  %v24_v6 = vpop.permute.xlu1 %23  }
  0x7d   :  { %14 = vst.msk [vmem:[#allocation0] sm:$0x1] %vm13_vm1, %v12_v5  }
  0x80   :  { %v18_v7 = vpop.permute.xlu0 %17  }
  0x81   :  { %20 = vst.msk [vmem:[#allocation0] sm:$0x1] %vm19_vm2, %v18_v7  }
  0x82   :  { %26 = vst.msk [vmem:[#allocation0] sm:$0x1] %vm25_vm3, %v24_v6  }
  0x89   :  { %v30_v8 = vld [vmem:[#allocation0] sm:$0x1] }
  0x8a   :  { %32 = vst [vmem:[%s56_s1] sm:$0x1] %v30_v8 }

// kernel: squeeze.3
= control target key start
LH: loop header
LB: loop body
LE: loop exit
PB: predicated region body
PF: predicated region fallthrough
CT: control target
= control target key end

     0   :  { %s176_s8 = smov 104   ;;  %s177_s9 = smov 112   ;;  %vm7_vm0 = vcmask 64512   ;;  %s331_s0 = inlined_call_operand.vmem [shape: f32[4,128], index: 0, kind: input, shape index: {}]   ;;  %s332_s1 = inlined_call_operand.vmem [shape: f32[64,8], index: 1, kind: output, shape index: {}]  }
   0x1   :  { %v4_v0 = vld [vmem:[%s331_s0] sm:$0xf]  ;;  %s175_s0 = smov 120   ;;  %s178_s10 = smov 96  }
   0x2   :  { %5 = vst [vmem:[#allocation0] sm:$0xf] %v4_v0  ;;  %s179_s11 = smov 88   ;;  %s180_s12 = smov 80  }
   0x3   :  { %s181_s13 = smov 72   ;;  %s182_s14 = smov 64  }
   0x4   :  { %s183_s19 = smov 56   ;;  %s184_s20 = smov 48  }
   0x5   :  { %s185_s21 = smov 40   ;;  %s186_s22 = smov 32  }
   0x6   :  { %s187_s23 = smov 24   ;;  %s188_s24 = smov 16  }
   0x7   :  { %s189_s25 = smov 8  }
   0x9   :  { %v10_v1 = vld [vmem:[#allocation0] sm:$0xf]  }
   0xa   :  { %v26_v2 = vld [vmem:[#allocation0] sm:$0xf]   ;;  %11 = vrot.lane.b32.xlu0 %v10_v1, %s175_s0 }
   0xb   :  { %27 = vrot.lane.b32.xlu1 %v26_v2, %s176_s8  ;;  %v18_v3 = vld [vmem:[#allocation0] sm:$0xf]  }
   0xc   :  { %v34_v4 = vld [vmem:[#allocation0] sm:$0xf]  }
   0xd   :  { %v42_v5 = vld [vmem:[#allocation0] sm:$0xf]  }
   0xe   :  { %19 = vrot.lane.b32.xlu0 %v18_v3, %s177_s9  ;;  %v50_v6 = vld [vmem:[#allocation0] sm:$0xf]  }
   0xf   :  { %35 = vrot.lane.b32.xlu1 %v34_v4, %s178_s10  ;;  %v58_v7 = vld [vmem:[#allocation0] sm:$0xf]  }
  0x10   :  { %v66_v8 = vld [vmem:[#allocation0] sm:$0xf]  }
  0x11   :  { %v74_v9 = vld [vmem:[#allocation0] sm:$0xf]  }
  0x12   :  { %43 = vrot.lane.b32.xlu0 %v42_v5, %s179_s11  ;;  %v82_v10 = vld [vmem:[#allocation0] sm:$0xf]  }
  0x13   :  { %51 = vrot.lane.b32.xlu1 %v50_v6, %s180_s12  ;;  %v6_v11 = vld [vmem:[#allocation0] sm:$0xf]  }
  0x14   :  { %8 = vst.msk [vmem:[%s332_s1] ss:$16 sm:$0x3] %vm7_vm0, %v6_v11   ;;  %9 = vst.msk [vmem:[%s332_s1] ss:$16 sm:$0xc] %vm7_vm0, %v6_v11  }
  0x15   :  { %v90_v12 = vld [vmem:[#allocation0] sm:$0xf]  }
  0x16   :  { %59 = vrot.lane.b32.xlu0 %v58_v7, %s181_s13  ;;  %v98_v13 = vld [vmem:[#allocation0] sm:$0xf]  }
  0x17   :  { %67 = vrot.lane.b32.xlu1 %v66_v8, %s182_s14  ;;  %v106_v14 = vld [vmem:[#allocation0] sm:$0xf]  }
  0x18   :  { %v114_v15 = vld [vmem:[#allocation0] sm:$0xf]  }
  0x19   :  { %v122_v16 = vld [vmem:[#allocation0] sm:$0xf]  }
  0x1a   :  { %75 = vrot.lane.b32.xlu0 %v74_v9, %s183_s19 }
  0x1b   :  { %83 = vrot.lane.b32.xlu1 %v82_v10, %s184_s20 }
  0x1e   :  { %91 = vrot.lane.b32.xlu0 %v90_v12, %s185_s21 }
  0x1f   :  { %99 = vrot.lane.b32.xlu1 %v98_v13, %s186_s22 }
  0x22   :  { %107 = vrot.lane.b32.xlu0 %v106_v14, %s187_s23 }
  0x23   :  { %115 = vrot.lane.b32.xlu1 %v114_v15, %s188_s24 }
  0x26   :  { %123 = vrot.lane.b32.xlu0 %v122_v16, %s189_s25 }
  0x7c   :  { %v12_v17 = vpop.permute.xlu0 %11  }
  0x7d   :  { %v28_v18 = vpop.permute.xlu1 %27   ;;  %130 = vst.msk [vmem:[%s332_s1 + $0x1] ss:$16 sm:$0x3] %vm7_vm0, %v12_v17   ;;  %131 = vst.msk [vmem:[%s332_s1 + $0x1] ss:$16 sm:$0xc] %vm7_vm0, %v12_v17  }
  0x7e   :  { %134 = vst.msk [vmem:[%s332_s1 + $0x3] ss:$16 sm:$0x3] %vm7_vm0, %v28_v18   ;;  %135 = vst.msk [vmem:[%s332_s1 + $0x3] ss:$16 sm:$0xc] %vm7_vm0, %v28_v18  }
  0x80   :  { %v20_v19 = vpop.permute.xlu0 %19  }
  0x81   :  { %v36_v20 = vpop.permute.xlu1 %35   ;;  %132 = vst.msk [vmem:[%s332_s1 + $0x2] ss:$16 sm:$0x3] %vm7_vm0, %v20_v19   ;;  %133 = vst.msk [vmem:[%s332_s1 + $0x2] ss:$16 sm:$0xc] %vm7_vm0, %v20_v19  }
  0x82   :  { %136 = vst.msk [vmem:[%s332_s1 + $0x4] ss:$16 sm:$0x3] %vm7_vm0, %v36_v20   ;;  %137 = vst.msk [vmem:[%s332_s1 + $0x4] ss:$16 sm:$0xc] %vm7_vm0, %v36_v20  }
  0x84   :  { %v44_v21 = vpop.permute.xlu0 %43  }
  0x85   :  { %v52_v22 = vpop.permute.xlu1 %51   ;;  %138 = vst.msk [vmem:[%s332_s1 + $0x5] ss:$16 sm:$0x3] %vm7_vm0, %v44_v21   ;;  %139 = vst.msk [vmem:[%s332_s1 + $0x5] ss:$16 sm:$0xc] %vm7_vm0, %v44_v21  }
  0x86   :  { %140 = vst.msk [vmem:[%s332_s1 + $0x6] ss:$16 sm:$0x3] %vm7_vm0, %v52_v22   ;;  %141 = vst.msk [vmem:[%s332_s1 + $0x6] ss:$16 sm:$0xc] %vm7_vm0, %v52_v22  }
  0x88   :  { %v60_v23 = vpop.permute.xlu0 %59  }
  0x89   :  { %v68_v24 = vpop.permute.xlu1 %67   ;;  %142 = vst.msk [vmem:[%s332_s1 + $0x7] ss:$16 sm:$0x3] %vm7_vm0, %v60_v23   ;;  %143 = vst.msk [vmem:[%s332_s1 + $0x7] ss:$16 sm:$0xc] %vm7_vm0, %v60_v23  }
  0x8a   :  { %144 = vst.msk [vmem:[%s332_s1 + $0x8] ss:$16 sm:$0x3] %vm7_vm0, %v68_v24   ;;  %145 = vst.msk [vmem:[%s332_s1 + $0x8] ss:$16 sm:$0xc] %vm7_vm0, %v68_v24  }
  0x8c   :  { %v76_v25 = vpop.permute.xlu0 %75  }
  0x8d   :  { %v84_v26 = vpop.permute.xlu1 %83   ;;  %146 = vst.msk [vmem:[%s332_s1 + $0x9] ss:$16 sm:$0x3] %vm7_vm0, %v76_v25   ;;  %147 = vst.msk [vmem:[%s332_s1 + $0x9] ss:$16 sm:$0xc] %vm7_vm0, %v76_v25  }
  0x8e   :  { %148 = vst.msk [vmem:[%s332_s1 + $0xa] ss:$16 sm:$0x3] %vm7_vm0, %v84_v26   ;;  %149 = vst.msk [vmem:[%s332_s1 + $0xa] ss:$16 sm:$0xc] %vm7_vm0, %v84_v26  }
  0x90   :  { %v92_v27 = vpop.permute.xlu0 %91  }
  0x91   :  { %v100_v28 = vpop.permute.xlu1 %99   ;;  %150 = vst.msk [vmem:[%s332_s1 + $0xb] ss:$16 sm:$0x3] %vm7_vm0, %v92_v27   ;;  %151 = vst.msk [vmem:[%s332_s1 + $0xb] ss:$16 sm:$0xc] %vm7_vm0, %v92_v27  }
  0x92   :  { %152 = vst.msk [vmem:[%s332_s1 + $0xc] ss:$16 sm:$0x3] %vm7_vm0, %v100_v28   ;;  %153 = vst.msk [vmem:[%s332_s1 + $0xc] ss:$16 sm:$0xc] %vm7_vm0, %v100_v28  }
  0x94   :  { %v108_v29 = vpop.permute.xlu0 %107  }
  0x95   :  { %v116_v30 = vpop.permute.xlu1 %115   ;;  %154 = vst.msk [vmem:[%s332_s1 + $0xd] ss:$16 sm:$0x3] %vm7_vm0, %v108_v29   ;;  %155 = vst.msk [vmem:[%s332_s1 + $0xd] ss:$16 sm:$0xc] %vm7_vm0, %v108_v29  }
  0x96   :  { %156 = vst.msk [vmem:[%s332_s1 + $0xe] ss:$16 sm:$0x3] %vm7_vm0, %v116_v30   ;;  %157 = vst.msk [vmem:[%s332_s1 + $0xe] ss:$16 sm:$0xc] %vm7_vm0, %v116_v30  }
  0x98   :  { %v124_v31 = vpop.permute.xlu0 %123  }
  0x99   :  { %158 = vst.msk [vmem:[%s332_s1 + $0xf] ss:$16 sm:$0x3] %vm7_vm0, %v124_v31   ;;  %159 = vst.msk [vmem:[%s332_s1 + $0xf] ss:$16 sm:$0xc] %vm7_vm0, %v124_v31  }

// kernel: simplenet_batched.1
= control target key start
LH: loop header
LB: loop body
LE: loop exit
PB: predicated region body
PF: predicated region fallthrough
CT: control target
= control target key end

     0   :  { %8 = vsyncpa [#allocation3], 0  ;;  %s1171_s12 = smov 0   ;;  %s1372_s0 = inlined_call_operand.vmem [shape: f32[576,128], index: 0, kind: input, shape index: {}]   ;;  %s1373_s1 = inlined_call_operand.vmem [shape: f32[512,16], index: 1, kind: input, shape index: {}]   ;;  %s1374_s2 = inlined_call_operand.hbm [shape: f32[88,128], index: 2, kind: input, shape index: {}]   ;;  %s1375_s3 = inlined_call_operand.vmem [shape: f32[576,128], index: 3, kind: output, shape index: {}]  }
   0x1 LB: > { %s1177_s13 = sadd.s32 4294967295, %s1144_s12   ;;  %p874_p0 = scmp.ge.s32.totalorder %s1144_s12, 1  ;;  %s1144_s12 = sphi %s1171_s12, %s14_s12  }
   0x2   : > { %p118_p1 = scmp.lt.s32.totalorder %s1144_s12, 5  ;;  %s1146_s14 = smov [#allocation2]  }
   0x3   : > { %s130_s15 = sshll.u32 %s1146_s14, 4  ;;  %p1376_p3 = scmp.eq.s32.totalorder %s1177_s13, 0  ;;  %s131_s15 = int_to_ptr.vmem [resolvable:$true] %s130_s15 }
   0x4   : > { %p1181_p2 = pnand %p874_p0, %p118_p1  ;;  %s1106_s20 = scalar_lea.hbm %s1374_s2, 1408 }
   0x5   : > { %p1107_p6 = scmp.ne.s32.totalorder %s1374_s2, %s1106_s20  ;;  %p1113_p10 = scmp.lt.u32.totalorder %s1106_s20, %s1374_s2 }
   0x6   : > { %s1378_s16 = scalar_select %p1181_p2, 1, 0 }
   0x7   : > { %p1087_p4 = pneg %p1181_p2 }
   0x9   : > { %p1190_p5 = pnand %p1376_p3, %p1087_p4 }
   0xb   : > { %p1108_p7 = pneg %p1190_p5 }
   0xd   : > { %p1109_p8 = pnand %p1108_p7, %p1107_p6 }
   0xf   : > { %p1110_p9 = pneg %p1109_p8 }
  0x11   : > { %p1115_p11 = pnand %p1113_p10, %p1110_p9 }
  0x13   : > { %1118 = shalt.err (!%p1115_p11)
}
  0x14   : > { %s1119_s25 = scalar_lea.vmem %s131_s15, 1408  ;;  %p1127_p1 = scmp.lt.s32.totalorder %s131_s15, %s131_s15 }
  0x15   : > { %p1120_p12 = scmp.ne.s32.totalorder %s131_s15, %s1119_s25  ;;  %p1128_p4 = scmp.lt.s32.totalorder %s1119_s25, %s1119_s25 }
  0x17   : > { %p1122_p13 = pnand %p1120_p12, %p1108_p7  ;;  %p1129_p3 = por %p1128_p4, %p1127_p1 }
  0x19   : > { %p1123_p0 = pneg %p1122_p13 }
  0x1b   : > { %p1130_p2 = pnand %p1129_p3, %p1123_p0 }
  0x1d   : > { %1133 = shalt.err (!%p1130_p2)
}
  0x1e   : > { %s1147_s26 = smov 128   ;;  %s1148_s27 = smov 8  }
  0x1f   : > { %1090 = dma.hbm_to_vmem [thread:$0]  (!%p1190_p5), %s1374_s2, 1408, %s131_s15, [#allocation3], %s1147_s26, %s1147_s26, %s1148_s27  }
  0x20   : > { %p1380_p6 = scmp.ne.s32.totalorder %s1378_s16, 0 }
  0x21   : > { %p1381_p8 = scmp.eq.s32.totalorder (!%p1380_p6), %s1177_s13, 0 }
  0x22   : > { %164 = sbr.rel (%p1380_p6) target bundleno = 1052 (0x41c), region = 32 }
  0x29   : > { %1139 = dma.done.wait (%p1381_p8), [#allocation3], 1408   ;;  %p1382_p7 = pmov %p1381_p8 }
  0x2a   : > { %s880_s30 = sshll.u32 %s1177_s13, 4  ;;  %v263_v0 = vld [vmem:[#allocation2] sm:$0xff]  ;;  %v264_v1 = vld [vmem:[#allocation2 + $0x8] sm:$0xff]  ;;  %vm280_vm0 = vcmask 130048   ;;  %s193_s8 = smul.u32 18, %s1177_s13  ;;  %v266_v54 = vld [vmem:[#allocation2 + $0x10] sm:$0xff] }
  0x2b   : > { %1141 = vsyncadd (%p1382_p7), [#allocation3], 4294965888  ;;  %p200_p2 = scmp.lt.s32.totalorder %s880_s30, 63  ;;  %v265_v3 = vpack.c.bf16 %v264_v1, %v263_v0  ;;  %v267_v55 = vld [vmem:[#allocation2 + $0x18] sm:$0xff]  ;;  %v268_v61 = vld [vmem:[#allocation2 + $0x20] sm:$0xff]  ;;  %vm535_vm1 = vcmask 523264  }
  0x2c   : > { %p194_p3 = scmp.lt.s32.totalorder %s193_s8, 71  ;;  %v274_v60 = vpack.c.bf16 %v267_v55, %v266_v54  ;;  %v269_v62 = vld [vmem:[#allocation2 + $0x28] sm:$0xff]  ;;  %vm1150_vm2 = vmmov 0  }
  0x2d   : > { %s1384_s30 = smov (!%p200_p2, %s880_s30), 63  ;;  %957 = vmatprep.subr.bf16.mxu0 %v265_v3  ;;  %v275_v1 = vpack.c.bf16 %v269_v62, %v268_v61 }
  0x2e   : > { %s881_s4 = sshll.u32 %s1384_s30, 3  ;;  %958 = vmatpush3.bf16.msra.mxu0 %v265_v3  ;;  %s1386_s8 = smov (!%p194_p3, %s193_s8), 71  ;;  %v271_v3 = vld [vmem:[#allocation2 + $0x38] sm:$0xff] }
  0x2f   : > { %s1220_s7 = scalar_lea.vmem %s1373_s1, %s881_s4  ;;  %s879_s9 = sshll.u32 %s1386_s8, 3 }
  0x30   : > { %v239_v2 = vld [vmem:[%s1220_s7] sm:$0xff]  ;;  %v240_v4 = vld [vmem:[%s1220_s7 + $0x8] sm:$0xff]  ;;  %v241_v5 = vld [vmem:[%s1220_s7 + $0x10] sm:$0xff]  ;;  %s1255_s14 = scalar_lea.vmem %s1372_s0, %s879_s9  ;;  %s1331_s16 = scalar_lea.vmem %s1375_s3, %s879_s9 }
  0x31   : > { %v242_v6 = vld [vmem:[%s1220_s7 + $0x18] sm:$0xff]  ;;  %v255_v7 = vpack.c.bf16 %v240_v4, %v239_v2  ;;  %v243_v8 = vld [vmem:[%s1220_s7 + $0x20] sm:$0xff]  ;;  %v244_v9 = vld [vmem:[%s1220_s7 + $0x28] sm:$0xff] }
  0x32   : > { %v256_v10 = vpack.c.bf16 %v242_v6, %v241_v5  ;;  %v257_v11 = vpack.c.bf16 %v244_v9, %v243_v8  ;;  %v245_v12 = vld [vmem:[%s1220_s7 + $0x30] sm:$0xff]  ;;  %v246_v13 = vld [vmem:[%s1220_s7 + $0x38] sm:$0xff]  ;;  %v247_v14 = vld [vmem:[%s1220_s7 + $0x40] sm:$0xff] }
  0x33   : > { %959 = vmatprep.mubr.msk.bf16.mxu0 %vm280_vm0, %v255_v7  ;;  %v248_v15 = vld [vmem:[%s1220_s7 + $0x48] sm:$0xff]  ;;  %v258_v16 = vpack.c.bf16 %v246_v13, %v245_v12  ;;  %v249_v18 = vld [vmem:[%s1220_s7 + $0x50] sm:$0xff]  ;;  %v250_v19 = vld [vmem:[%s1220_s7 + $0x58] sm:$0xff] }
  0x34   : > { %960 = vmatmul.mubr.msk.bf16.vlgmr.msra.gmra.mrb[0].mxu0 %vm280_vm0, %v256_v10  ;;  %v259_v17 = vpack.c.bf16 %v248_v15, %v247_v14  ;;  %v251_v20 = vld [vmem:[%s1220_s7 + $0x60] sm:$0xff]  ;;  %v252_v21 = vld [vmem:[%s1220_s7 + $0x68] sm:$0xff]  ;;  %v260_v22 = vpack.c.bf16 %v250_v19, %v249_v18  ;;  %v253_v24 = vld [vmem:[%s1220_s7 + $0x70] sm:$0xff] }
  0x35   : > { %963 = vmatprep.mubr.msk.bf16.mxu0 %vm280_vm0, %v257_v11  ;;  %v261_v23 = vpack.c.bf16 %v252_v21, %v251_v20  ;;  %v254_v25 = vld [vmem:[%s1220_s7 + $0x78] sm:$0xff]  ;;  %v212_v27 = vld [vmem:[%s1255_s14] sm:$0xff]  ;;  %v213_v28 = vld [vmem:[%s1255_s14 + $0x8] sm:$0xff] }
  0x36   : > { %v262_v26 = vpack.c.bf16 %v254_v25, %v253_v24  ;;  %v1259_v29 = vpack.c.bf16 %v213_v28, %v212_v27  ;;  %v214_v56 = vld [vmem:[%s1255_s14 + $0x10] sm:$0xff]  ;;  %v215_v57 = vld [vmem:[%s1255_s14 + $0x18] sm:$0xff]  ;;  %v216_v58 = vld [vmem:[%s1255_s14 + $0x20] sm:$0xff] }
  0x37   : > { %v217_v59 = vld [vmem:[%s1255_s14 + $0x28] sm:$0xff]  ;;  %v1266_v63 = vpack.c.bf16 %v215_v57, %v214_v56  ;;  %v270_v2 = vld [vmem:[#allocation2 + $0x30] sm:$0xff]  ;;  %v219_v5 = vld [vmem:[%s1255_s14 + $0x38] sm:$0xff] }
  0x38   : > { %v1268_v0 = vpack.c.bf16 %v217_v59, %v216_v58  ;;  %v218_v4 = vld [vmem:[%s1255_s14 + $0x30] sm:$0xff]  ;;  %v220_v6 = vld [vmem:[%s1255_s14 + $0x40] sm:$0xff]  ;;  %v221_v7 = vld [vmem:[%s1255_s14 + $0x48] sm:$0xff]  ;;  %v276_v8 = vpack.c.bf16 %v271_v3, %v270_v2 }
  0x39   : > { %v1276_v9 = vpack.c.bf16 %v219_v5, %v218_v4  ;;  %v1278_v10 = vpack.c.bf16 %v221_v7, %v220_v6  ;;  %v222_v11 = vld [vmem:[%s1255_s14 + $0x50] sm:$0xff]  ;;  %v223_v12 = vld [vmem:[%s1255_s14 + $0x58] sm:$0xff]  ;;  %v224_v13 = vld [vmem:[%s1255_s14 + $0x60] sm:$0xff] }
  0x3a   : > { %v225_v14 = vld [vmem:[%s1255_s14 + $0x68] sm:$0xff]  ;;  %v1286_v15 = vpack.c.bf16 %v223_v12, %v222_v11  ;;  %v227_v18 = vld [vmem:[%s1255_s14 + $0x78] sm:$0xff]  ;;  %v272_v20 = vld [vmem:[#allocation2 + $0x40] sm:$0xff] }
  0x3b   : > { %v273_v21 = vld [vmem:[#allocation2 + $0x48] sm:$0xff] }
  0x3c   : > { %964 = vmatmul.mubr.msk.bf16.gmra.mrb[4].mxu0 %vm280_vm0, %v258_v16  ;;  %v1288_v16 = vpack.c.bf16 %v225_v14, %v224_v13 }
  0x3d   : > { %967 = vmatprep.mubr.msk.bf16.mxu0 %vm280_vm0, %v259_v17  ;;  %v226_v17 = vld [vmem:[%s1255_s14 + $0x70] sm:$0xff] }
  0x3e   : > { %v1294_v19 = vpack.c.bf16 %v227_v18, %v226_v17 }
  0x44   : > { %968 = vmatmul.mubr.msk.bf16.gmra.mrb[8].mxu0 %vm280_vm0, %v260_v22  ;;  %v277_v22 = vpack.c.bf16 %v273_v21, %v272_v20 }
  0x45   : > { %971 = vmatprep.mubr.msk.bf16.mxu0 %vm280_vm0, %v261_v23  ;;  %v891_v23 = vld [vmem:[#allocation2 + $0x50] ss:$0 sm:$0xff] }
  0x4c   : > { %972 = vmatmul.mubr.msk.bf16.gmra.mrb[12].mxu0 %vm280_vm0, %v262_v26 }
  0x4d   : > { %991 = vmatprep.mubr.bf16.mxu0 %v1259_v29 }
 0x107   : > { %v961_v30 = vpop.f32.mrb[0].mxu0 }
 0x108   : > { %v339_v31 = vpop.f32.mrb[1].mxu0 }
 0x109   : > { %v962_v32 = vpop.f32.mrb[2].mxu0 }
 0x10a   : > { %v403_v33 = vpack.c.bf16 %v962_v32, %v961_v30  ;;  %v342_v34 = vpop.f32.mrb[3].mxu0 }
 0x10b   : > { %v402_v35 = vpack.c.bf16 %v342_v34, %v339_v31 }
 0x10d   : > { %975 = vmatprep.subr.bf16.mxu0 %v402_v35 }
 0x10e   : > { %976 = vmatpush3.bf16.msra.mxu0 %v402_v35 }
 0x10f   : > { %v965_v36 = vpop.f32.mrb[4].mxu0  ;;  %977 = vmatprep.subr.bf16.mxu0 %v403_v33 }
 0x110   : > { %v355_v37 = vpop.f32.mrb[5].mxu0 }
 0x111   : > { %v966_v38 = vpop.f32.mrb[6].mxu0 }
 0x112   : > { %v405_v39 = vpack.c.bf16 %v966_v38, %v965_v36  ;;  %v358_v40 = vpop.f32.mrb[7].mxu0  ;;  %978 = vmatpush3.bf16.msra.mxu0 %v403_v33 }
 0x113   : > { %v404_v41 = vpack.c.bf16 %v358_v40, %v355_v37 }
 0x115   : > { %979 = vmatprep.subr.bf16.mxu0 %v404_v41 }
 0x116   : > { %980 = vmatpush3.bf16.msra.mxu0 %v404_v41 }
 0x117   : > { %v969_v42 = vpop.f32.mrb[8].mxu0  ;;  %981 = vmatprep.subr.bf16.mxu0 %v405_v39 }
 0x118   : > { %v371_v43 = vpop.f32.mrb[9].mxu0 }
 0x119   : > { %v970_v44 = vpop.f32.mrb[10].mxu0 }
 0x11a   : > { %v407_v45 = vpack.c.bf16 %v970_v44, %v969_v42  ;;  %v374_v46 = vpop.f32.mrb[11].mxu0  ;;  %982 = vmatpush3.bf16.msra.mxu0 %v405_v39 }
 0x11b   : > { %v406_v47 = vpack.c.bf16 %v374_v46, %v371_v43 }
 0x11d   : > { %983 = vmatprep.subr.bf16.mxu0 %v406_v47 }
 0x11e   : > { %984 = vmatpush3.bf16.msra.mxu0 %v406_v47 }
 0x11f   : > { %v973_v48 = vpop.f32.mrb[12].mxu0  ;;  %985 = vmatprep.subr.bf16.mxu0 %v407_v45 }
 0x120   : > { %v387_v49 = vpop.f32.mrb[13].mxu0 }
 0x121   : > { %v974_v50 = vpop.f32.mrb[14].mxu0 }
 0x122   : > { %v409_v51 = vpack.c.bf16 %v974_v50, %v973_v48  ;;  %v390_v52 = vpop.f32.mrb[15].mxu0  ;;  %986 = vmatpush3.bf16.msra.mxu0 %v407_v45 }
 0x123   : > { %v408_v53 = vpack.c.bf16 %v390_v52, %v387_v49 }
 0x125   : > { %987 = vmatprep.subr.bf16.mxu0 %v408_v53 }
 0x126   : > { %988 = vmatpush3.bf16.msra.mxu0 %v408_v53 }
 0x127   : > { %989 = vmatprep.subr.bf16.mxu0 %v409_v51 }
 0x12a   : > { %990 = vmatpush3.bf16.msra.mxu0 %v409_v51 }
 0x12b   : > { %1007 = vmatprep.subr.bf16.mxu0 %v274_v60 }
 0x12d   : > { %992 = vmatmul.mubr.bf16.vlgmr.msra.gmra.mrb[16].mxu0 %v1266_v63 }
 0x12e   : > { %995 = vmatprep.mubr.bf16.mxu0 %v1268_v0  ;;  %1008 = vmatpush3.bf16.msra.mxu0 %v274_v60 }
 0x12f   : > { %1009 = vmatprep.subr.bf16.mxu0 %v275_v1 }
 0x132   : > { %1010 = vmatpush3.bf16.msra.mxu0 %v275_v1 }
 0x133   : > { %1011 = vmatprep.subr.bf16.mxu0 %v276_v8 }
 0x135   : > { %996 = vmatmul.mubr.bf16.gmra.mrb[20].mxu0 %v1276_v9 }
 0x136   : > { %999 = vmatprep.mubr.bf16.mxu0 %v1278_v10  ;;  %1012 = vmatpush3.bf16.msra.mxu0 %v276_v8 }
 0x137   : > { %1013 = vmatprep.subr.bf16.mxu0 %v277_v22 }
 0x13a   : > { %1014 = vmatpush3.bf16.msra.mxu0 %v277_v22 }
 0x13d   : > { %1000 = vmatmul.mubr.bf16.gmra.mrb[24].mxu0 %v1286_v15 }
 0x13e   : > { %1003 = vmatprep.mubr.bf16.mxu0 %v1288_v16 }
 0x145   : > { %1004 = vmatmul.mubr.bf16.gmra.mrb[28].mxu0 %v1294_v19 }
 0x200   : > { %v993_v24 = vpop.f32.mrb[16].mxu0 }
 0x201   : > { %v457_v25 = vadd.f32 %v993_v24, %v891_v23  ;;  %v448_v26 = vpop.f32.mrb[17].mxu0 }
 0x202   : > { %v449_v27 = vadd.f32 %v891_v23, %v448_v26  ;;  %v994_v28 = vpop.f32.mrb[18].mxu0 }
 0x203   : > { %v460_v30 = vadd.f32 %v994_v28, %v891_v23  ;;  %v451_v31 = vpop.f32.mrb[19].mxu0  ;;  %v513_v33 = vmax.f32 %v457_v25, 0.0  ;;  %v1149_v25 = vmov 0.0  }
 0x204   : > { %v452_v32 = vadd.f32 %v891_v23, %v451_v31  ;;  %v511_v35 = vmax.f32 %v449_v27, 0.0  ;;  %1031 = vmatprep.subr.bf16.mxu1 %v1149_v25  ;;  %1047 = vmatprep.mubr.msk.bf16.mxu1 %vm1150_vm2, %v1149_v25 }
 0x205   : > { %v514_v34 = vmax.f32 %v460_v30, 0.0 }
 0x206   : > { %v512_v36 = vmax.f32 %v452_v32, 0.0 }
 0x207   : > { %v528_v37 = vpack.c.bf16 %v514_v34, %v513_v33 }
 0x208   : > { %v527_v38 = vpack.c.bf16 %v512_v36, %v511_v35  ;;  %v997_v39 = vpop.f32.mrb[20].mxu0 }
 0x209   : > { %v473_v40 = vadd.f32 %v997_v39, %v891_v23  ;;  %v464_v41 = vpop.f32.mrb[21].mxu0 }
 0x20a   : > { %v465_v42 = vadd.f32 %v891_v23, %v464_v41  ;;  %v998_v43 = vpop.f32.mrb[22].mxu0  ;;  %1015 = vmatprep.mubr.msk.bf16.mxu0 %vm535_vm1, %v527_v38 }
 0x20b   : > { %v476_v44 = vadd.f32 %v998_v43, %v891_v23  ;;  %v467_v45 = vpop.f32.mrb[23].mxu0  ;;  %1016 = vmatmul.mubr.msk.bf16.vlgmr.msra.gmra.mrb[32].mxu0 %vm535_vm1, %v528_v37  ;;  %v517_v47 = vmax.f32 %v473_v40, 0.0 }
 0x20c   : > { %v468_v46 = vadd.f32 %v891_v23, %v467_v45  ;;  %v515_v49 = vmax.f32 %v465_v42, 0.0 }
 0x20d   : > { %v518_v48 = vmax.f32 %v476_v44, 0.0 }
 0x20e   : > { %v516_v50 = vmax.f32 %v468_v46, 0.0 }
 0x20f   : > { %v530_v51 = vpack.c.bf16 %v518_v48, %v517_v47 }
 0x210   : > { %v529_v52 = vpack.c.bf16 %v516_v50, %v515_v49  ;;  %v1001_v53 = vpop.f32.mrb[24].mxu0 }
 0x211   : > { %v489_v54 = vadd.f32 %v1001_v53, %v891_v23  ;;  %v480_v55 = vpop.f32.mrb[25].mxu0 }
 0x212   : > { %v481_v56 = vadd.f32 %v891_v23, %v480_v55  ;;  %v1002_v57 = vpop.f32.mrb[26].mxu0  ;;  %1019 = vmatprep.mubr.msk.bf16.mxu0 %vm535_vm1, %v529_v52 }
 0x213   : > { %v492_v58 = vadd.f32 %v1002_v57, %v891_v23  ;;  %v483_v59 = vpop.f32.mrb[27].mxu0  ;;  %1020 = vmatmul.mubr.msk.bf16.gmra.mrb[36].mxu0 %vm535_vm1, %v530_v51  ;;  %v521_v61 = vmax.f32 %v489_v54, 0.0 }
 0x214   : > { %v484_v60 = vadd.f32 %v891_v23, %v483_v59  ;;  %v519_v1 = vmax.f32 %v481_v56, 0.0 }
 0x215   : > { %v522_v62 = vmax.f32 %v492_v58, 0.0 }
 0x216   : > { %v520_v2 = vmax.f32 %v484_v60, 0.0 }
 0x217   : > { %v532_v3 = vpack.c.bf16 %v522_v62, %v521_v61 }
 0x218   : > { %v531_v4 = vpack.c.bf16 %v520_v2, %v519_v1  ;;  %v1005_v5 = vpop.f32.mrb[28].mxu0 }
 0x219   : > { %v505_v6 = vadd.f32 %v1005_v5, %v891_v23  ;;  %v496_v7 = vpop.f32.mrb[29].mxu0 }
 0x21a   : > { %v497_v8 = vadd.f32 %v891_v23, %v496_v7  ;;  %v1006_v11 = vpop.f32.mrb[30].mxu0  ;;  %1023 = vmatprep.mubr.msk.bf16.mxu0 %vm535_vm1, %v531_v4 }
 0x21b   : > { %v508_v12 = vadd.f32 %v1006_v11, %v891_v23  ;;  %v499_v13 = vpop.f32.mrb[31].mxu0  ;;  %1024 = vmatmul.mubr.msk.bf16.gmra.mrb[40].mxu0 %vm535_vm1, %v532_v3  ;;  %v525_v17 = vmax.f32 %v505_v6, 0.0 }
 0x21c   : > { %v500_v14 = vadd.f32 %v891_v23, %v499_v13  ;;  %v523_v20 = vmax.f32 %v497_v8, 0.0 }
 0x21d   : > { %v526_v18 = vmax.f32 %v508_v12, 0.0 }
 0x21e   : > { %v524_v21 = vmax.f32 %v500_v14, 0.0 }
 0x21f   : > { %v534_v22 = vpack.c.bf16 %v526_v18, %v525_v17 }
 0x220   : > { %v533_v24 = vpack.c.bf16 %v524_v21, %v523_v20 }
 0x222   : > { %1027 = vmatprep.mubr.msk.bf16.mxu0 %vm535_vm1, %v533_v24 }
 0x223   : > { %1028 = vmatmul.mubr.msk.bf16.gmra.mrb[44].mxu0 %vm535_vm1, %v534_v22 }
 0x2de   : > { %v1017_v26 = vpop.f32.mrb[32].mxu0 }
 0x2df   : > { %v594_v27 = vpop.f32.mrb[33].mxu0 }
 0x2e0   : > { %v1018_v28 = vpop.f32.mrb[34].mxu0 }
 0x2e1   : > { %v658_v30 = vpack.c.bf16 %v1018_v28, %v1017_v26  ;;  %v597_v23 = vpop.f32.mrb[35].mxu0 }
 0x2e2   : > { %v657_v31 = vpack.c.bf16 %v597_v23, %v594_v27 }
 0x2e4   : > { %1032 = vmatpush3.bf16.msra.mxu1 %v657_v31 }
 0x2e5   : > { %1033 = vmatprep.subr.bf16.mxu1 %v1149_v25 }
 0x2e6   : > { %v1021_v32 = vpop.f32.mrb[36].mxu0 }
 0x2e7   : > { %v610_v33 = vpop.f32.mrb[37].mxu0 }
 0x2e8   : > { %v1022_v34 = vpop.f32.mrb[38].mxu0  ;;  %1034 = vmatpush3.bf16.msra.mxu1 %v658_v30 }
 0x2e9   : > { %v660_v35 = vpack.c.bf16 %v1022_v34, %v1021_v32  ;;  %v613_v36 = vpop.f32.mrb[39].mxu0  ;;  %1035 = vmatprep.subr.bf16.mxu1 %v1149_v25 }
 0x2ea   : > { %v659_v37 = vpack.c.bf16 %v613_v36, %v610_v33 }
 0x2ec   : > { %1036 = vmatpush3.bf16.msra.mxu1 %v659_v37 }
 0x2ed   : > { %1037 = vmatprep.subr.bf16.mxu1 %v1149_v25 }
 0x2ee   : > { %v1025_v38 = vpop.f32.mrb[40].mxu0 }
 0x2ef   : > { %v626_v39 = vpop.f32.mrb[41].mxu0 }
 0x2f0   : > { %v1026_v40 = vpop.f32.mrb[42].mxu0  ;;  %1038 = vmatpush3.bf16.msra.mxu1 %v660_v35 }
 0x2f1   : > { %v662_v41 = vpack.c.bf16 %v1026_v40, %v1025_v38  ;;  %v629_v42 = vpop.f32.mrb[43].mxu0  ;;  %1039 = vmatprep.subr.bf16.mxu1 %v1149_v25 }
 0x2f2   : > { %v661_v43 = vpack.c.bf16 %v629_v42, %v626_v39 }
 0x2f4   : > { %1040 = vmatpush3.bf16.msra.mxu1 %v661_v43 }
 0x2f5   : > { %1041 = vmatprep.subr.bf16.mxu1 %v1149_v25 }
 0x2f6   : > { %v1029_v44 = vpop.f32.mrb[44].mxu0 }
 0x2f7   : > { %v642_v45 = vpop.f32.mrb[45].mxu0 }
 0x2f8   : > { %v1030_v46 = vpop.f32.mrb[46].mxu0  ;;  %1042 = vmatpush3.bf16.msra.mxu1 %v662_v41 }
 0x2f9   : > { %v664_v47 = vpack.c.bf16 %v1030_v46, %v1029_v44  ;;  %v645_v48 = vpop.f32.mrb[47].mxu0  ;;  %1043 = vmatprep.subr.bf16.mxu1 %v1149_v25 }
 0x2fa   : > { %v663_v49 = vpack.c.bf16 %v645_v48, %v642_v45 }
 0x2fc   : > { %1044 = vmatpush3.bf16.msra.mxu1 %v663_v49 }
 0x2fd   : > { %1045 = vmatprep.subr.bf16.mxu1 %v1149_v25 }
 0x300   : > { %1046 = vmatpush3.bf16.msra.mxu1 %v664_v47 }
 0x303   : > { %1048 = vmatmul.mubr.bf16.vlgmr.msra.gmra.mrb[0].mxu1 %v1259_v29  ;;  %v228_v29 = vld [vmem:[%s1255_s14 + $0x80] sm:$0xff] }
 0x304   : > { %1051 = vmatprep.mubr.msk.bf16.mxu1 %vm1150_vm2, %v1149_v25 }
 0x30b   : > { %1052 = vmatmul.mubr.bf16.gmra.mrb[4].mxu1 %v1266_v63  ;;  %v229_v63 = vld [vmem:[%s1255_s14 + $0x88] sm:$0xff] }
 0x30c   : > { %1055 = vmatprep.mubr.msk.bf16.mxu1 %vm1150_vm2, %v1149_v25 }
 0x313   : > { %1056 = vmatmul.mubr.bf16.gmra.mrb[8].mxu1 %v1268_v0  ;;  %v238_v0 = vpack.c.bf16 %v229_v63, %v228_v29 }
 0x314   : > { %1059 = vmatprep.mubr.msk.bf16.mxu1 %vm1150_vm2, %v1149_v25 }
 0x31b   : > { %1060 = vmatmul.mubr.bf16.gmra.mrb[12].mxu1 %v1276_v9  ;;  %v1324_v9 = vld [vmem:[#allocation2 + $0x51] ss:$0 sm:$0xff] }
 0x31c   : > { %1063 = vmatprep.mubr.msk.bf16.mxu1 %vm1150_vm2, %v1149_v25 }
 0x323   : > { %1064 = vmatmul.mubr.bf16.gmra.mrb[16].mxu1 %v1278_v10 }
 0x324   : > { %1067 = vmatprep.mubr.msk.bf16.mxu1 %vm1150_vm2, %v1149_v25 }
 0x32b   : > { %1068 = vmatmul.mubr.bf16.gmra.mrb[20].mxu1 %v1286_v15 }
 0x32c   : > { %1071 = vmatprep.mubr.msk.bf16.mxu1 %vm1150_vm2, %v1149_v25 }
 0x333   : > { %1072 = vmatmul.mubr.bf16.gmra.mrb[24].mxu1 %v1288_v16 }
 0x334   : > { %1075 = vmatprep.mubr.msk.bf16.mxu1 %vm1150_vm2, %v1149_v25 }
 0x33b   : > { %1076 = vmatmul.mubr.bf16.gmra.mrb[28].mxu1 %v1294_v19 }
 0x33c   : > { %1079 = vmatprep.mubr.msk.bf16.mxu1 %vm1150_vm2, %v1149_v25 }
 0x343   : > { %1080 = vmatmul.mubr.bf16.gmra.mrb[32].mxu1 %v238_v0 }
 0x3d6   : > { %v703_v10 = vpop.f32.mrb[0].mxu1 }
 0x3d7   : > { %v704_v15 = vadd.f32 %v1324_v9, %v703_v10  ;;  %v1049_v16 = vpop.f32.mrb[1].mxu1 }
 0x3d8   : > { %v706_v19 = vpop.f32.mrb[2].mxu1 }
 0x3d9   : > { %774 = vst [vmem:[%s1331_s16] sm:$0xff] %v704_v15  ;;  %v707_v50 = vadd.f32 %v1324_v9, %v706_v19  ;;  %v1050_v51 = vpop.f32.mrb[3].mxu1 }
 0x3db   : > { %775 = vst [vmem:[%s1331_s16 + $0x8] sm:$0xff] %v707_v50 }
 0x3de   : > { %v711_v52 = vpop.f32.mrb[4].mxu1 }
 0x3df   : > { %v712_v53 = vadd.f32 %v1324_v9, %v711_v52  ;;  %v1053_v54 = vpop.f32.mrb[5].mxu1 }
 0x3e0   : > { %v714_v55 = vpop.f32.mrb[6].mxu1 }
 0x3e1   : > { %776 = vst [vmem:[%s1331_s16 + $0x10] sm:$0xff] %v712_v53  ;;  %v715_v56 = vadd.f32 %v1324_v9, %v714_v55  ;;  %v1054_v57 = vpop.f32.mrb[7].mxu1 }
 0x3e3   : > { %777 = vst [vmem:[%s1331_s16 + $0x18] sm:$0xff] %v715_v56 }
 0x3e6   : > { %v719_v58 = vpop.f32.mrb[8].mxu1 }
 0x3e7   : > { %v720_v59 = vadd.f32 %v1324_v9, %v719_v58  ;;  %v1057_v60 = vpop.f32.mrb[9].mxu1 }
 0x3e8   : > { %v722_v61 = vpop.f32.mrb[10].mxu1 }
 0x3e9   : > { %778 = vst [vmem:[%s1331_s16 + $0x20] sm:$0xff] %v720_v59  ;;  %v723_v62 = vadd.f32 %v1324_v9, %v722_v61  ;;  %v1058_v1 = vpop.f32.mrb[11].mxu1 }
 0x3eb   : > { %779 = vst [vmem:[%s1331_s16 + $0x28] sm:$0xff] %v723_v62 }
 0x3ee   : > { %v727_v2 = vpop.f32.mrb[12].mxu1 }
 0x3ef   : > { %v728_v3 = vadd.f32 %v1324_v9, %v727_v2  ;;  %v1061_v4 = vpop.f32.mrb[13].mxu1 }
 0x3f0   : > { %v730_v5 = vpop.f32.mrb[14].mxu1 }
 0x3f1   : > { %780 = vst [vmem:[%s1331_s16 + $0x30] sm:$0xff] %v728_v3  ;;  %v731_v6 = vadd.f32 %v1324_v9, %v730_v5  ;;  %v1062_v7 = vpop.f32.mrb[15].mxu1 }
 0x3f3   : > { %781 = vst [vmem:[%s1331_s16 + $0x38] sm:$0xff] %v731_v6 }
 0x3f6   : > { %v735_v8 = vpop.f32.mrb[16].mxu1 }
 0x3f7   : > { %v736_v11 = vadd.f32 %v1324_v9, %v735_v8  ;;  %v1065_v12 = vpop.f32.mrb[17].mxu1 }
 0x3f8   : > { %v738_v13 = vpop.f32.mrb[18].mxu1 }
 0x3f9   : > { %782 = vst [vmem:[%s1331_s16 + $0x40] sm:$0xff] %v736_v11  ;;  %v739_v14 = vadd.f32 %v1324_v9, %v738_v13  ;;  %v1066_v17 = vpop.f32.mrb[19].mxu1 }
 0x3fb   : > { %783 = vst [vmem:[%s1331_s16 + $0x48] sm:$0xff] %v739_v14 }
 0x3fe   : > { %v743_v18 = vpop.f32.mrb[20].mxu1 }
 0x3ff   : > { %v744_v20 = vadd.f32 %v1324_v9, %v743_v18  ;;  %v1069_v21 = vpop.f32.mrb[21].mxu1 }
 0x400   : > { %v746_v22 = vpop.f32.mrb[22].mxu1 }
 0x401   : > { %784 = vst [vmem:[%s1331_s16 + $0x50] sm:$0xff] %v744_v20  ;;  %v747_v24 = vadd.f32 %v1324_v9, %v746_v22  ;;  %v1070_v25 = vpop.f32.mrb[23].mxu1 }
 0x403   : > { %785 = vst [vmem:[%s1331_s16 + $0x58] sm:$0xff] %v747_v24 }
 0x406   : > { %v751_v26 = vpop.f32.mrb[24].mxu1 }
 0x407   : > { %v752_v27 = vadd.f32 %v1324_v9, %v751_v26  ;;  %v1073_v28 = vpop.f32.mrb[25].mxu1 }
 0x408   : > { %v754_v30 = vpop.f32.mrb[26].mxu1 }
 0x409   : > { %786 = vst [vmem:[%s1331_s16 + $0x60] sm:$0xff] %v752_v27  ;;  %v755_v23 = vadd.f32 %v1324_v9, %v754_v30  ;;  %v1074_v31 = vpop.f32.mrb[27].mxu1 }
 0x40b   : > { %787 = vst [vmem:[%s1331_s16 + $0x68] sm:$0xff] %v755_v23 }
 0x40e   : > { %v759_v32 = vpop.f32.mrb[28].mxu1 }
 0x40f   : > { %v760_v33 = vadd.f32 %v1324_v9, %v759_v32  ;;  %v1077_v34 = vpop.f32.mrb[29].mxu1 }
 0x410   : > { %v762_v35 = vpop.f32.mrb[30].mxu1 }
 0x411   : > { %788 = vst [vmem:[%s1331_s16 + $0x70] sm:$0xff] %v760_v33  ;;  %v763_v36 = vadd.f32 %v1324_v9, %v762_v35  ;;  %v1078_v37 = vpop.f32.mrb[31].mxu1 }
 0x413   : > { %789 = vst [vmem:[%s1331_s16 + $0x78] sm:$0xff] %v763_v36 }
 0x416   : > { %v767_v38 = vpop.f32.mrb[32].mxu1 }
 0x417   : > { %v768_v39 = vadd.f32 %v1324_v9, %v767_v38  ;;  %v1081_v40 = vpop.f32.mrb[33].mxu1 }
 0x418   : > { %v770_v41 = vpop.f32.mrb[34].mxu1 }
 0x419   : > { %790 = vst [vmem:[%s1331_s16 + $0x80] sm:$0xff] %v768_v39  ;;  %v771_v42 = vadd.f32 %v1324_v9, %v770_v41  ;;  %v1082_v43 = vpop.f32.mrb[35].mxu1 }
 0x41b   : > { %791 = vst [vmem:[%s1331_s16 + $0x88] sm:$0xff] %v771_v42 }
 0x41c PF: > { %s14_s12 = sadd.s32 1, %s1144_s12  }
 0x41d   : > { %p11_p5 = scmp.ge.s32.totalorder %s14_s12, 6  }
 0x41f   :  { %13 = sbr.rel (!%p11_p5) target bundleno = 1 (0x1), region = 70 }
 0x426   :  { %814 = vsyncpa [#allocation3], 1 }
 0x427   :  { %816 = vsyncpa [#allocation3 + $0x1], 1 }

</bundles_post_ra>
